<compile_context>
chip_gen: v7x
topology: tpu7x:2x2x1
jax: 0.10.0
libtpu: 0.0.40
codegen_flags: <defaults>
</compile_context>

<pallas_src>
import jax
import jax.numpy as jnp
from jax.experimental import pallas as pl
from jax.experimental.pallas import tpu as pltpu


def _round_up(x, m):
    return ((x + m - 1) // m) * m


# ---------------------------------------------------------------------------
# Kernels
# ---------------------------------------------------------------------------
def _ffn_kernel_resident(x_ref, w1_ref, b1_ref, w2_ref, b2_ref, o_ref):
    """KF == 1: full d_ff is VMEM-resident, no scratch accumulator needed."""
    h = jnp.dot(x_ref[...], w1_ref[...], preferred_element_type=jnp.float32)
    h = jnp.maximum(h + b1_ref[...], 0.0)               # bias + ReLU in fp32
    out = jnp.dot(h.astype(w2_ref.dtype), w2_ref[...],
                  preferred_element_type=jnp.float32)
    o_ref[...] = (out + b2_ref[...]).astype(o_ref.dtype)


def _ffn_kernel_streamed(x_ref, w1_ref, b1_ref, w2_ref, b2_ref, o_ref, acc_ref):
    """KF > 1: d_ff streamed in chunks, fp32 VMEM accumulator over the k axis."""
    kf = pl.program_id(1)

    @pl.when(kf == 0)
    def _init():
        acc_ref[...] = jnp.zeros_like(acc_ref)

    # bias + ReLU are exact per d_ff-chunk (each hidden column depends only on
    # its own w1 column / b1 entry).
    h = jnp.dot(x_ref[...], w1_ref[...], preferred_element_type=jnp.float32)
    h = jnp.maximum(h + b1_ref[...], 0.0)
    acc_ref[...] += jnp.dot(h.astype(w2_ref.dtype), w2_ref[...],
                            preferred_element_type=jnp.float32)

    @pl.when(kf == pl.num_programs(1) - 1)
    def _finalize():
        # b2 added exactly once per row tile.
        o_ref[...] = (acc_ref[...] + b2_ref[...]).astype(o_ref.dtype)


# ---------------------------------------------------------------------------
# Tiling / VMEM budgeting
# ---------------------------------------------------------------------------
def _tpu_generation_params():
    """Per-generation tile targets and scoped-VMEM budget (conservative default)."""
    try:
        kind = jax.local_devices()[0].device_kind.lower()
    except Exception:
        kind = ""
    if "v7" in kind:     # 64 MiB physical VMEM, 2 TCs, ~1 PF/s bf16 per TC
        return dict(vmem_limit=48 << 20, tf_max=1024,
                    tm_resident=256, tm_streamed=768, cores=2)
    if "v6" in kind:     # 128 MiB VMEM, 918 TF/s bf16, ~1.4 TB/s HBM
        return dict(vmem_limit=96 << 20, tf_max=2048,
                    tm_resident=256, tm_streamed=1024, cores=1)
    if "v5" in kind:     # 128 MiB VMEM, 197 TF/s bf16 -> TM=256 already clears roofline
        return dict(vmem_limit=64 << 20, tf_max=1024,
                    tm_resident=256, tm_streamed=256, cores=1)
    return dict(vmem_limit=48 << 20, tf_max=1024,
                tm_resident=256, tm_streamed=512, cores=1)


def _tile_vmem_bytes(TM, TF, KF, d_model, cd_size, out_size):
    """Approximate resident VMEM for one pipelined step."""
    wbuf = 1 if KF == 1 else 2                       # k-invariant weights: 1 buffer
    acts = 2 * TM * d_model * (cd_size + out_size)   # x + out tiles, double-buffered
    wts = wbuf * 2 * d_model * TF * cd_size          # w1 chunk + w2 chunk
    bias = wbuf * TF * 4 + d_model * 4               # b1 chunk(s) + b2 (fp32)
    acc = TM * d_model * 4 if KF > 1 else 0          # fp32 accumulator scratch
    return acts + wts + bias + acc


def _select_tiles(M, d_model, d_ff, cd_size, out_size, gen,
                  tm_override=None, tf_override=None):
    budget = int(gen["vmem_limit"] * 0.85)
    m_cap = _round_up(M, 8)

    if tf_override is not None:
        TF = int(tf_override)
        assert d_ff % TF == 0 and (TF % 128 == 0 or TF == d_ff)
        cands = [TF]
    else:
        # Prefer full residency (KF == 1); otherwise 128-multiple divisors of d_ff.
        cands = [d_ff] + [t for t in range(gen["tf_max"], 127, -128)
                          if d_ff % t == 0 and t != d_ff]

    best = None
    for TF in cands:
        KF = d_ff // TF
        tm_goal = gen["tm_resident"] if KF == 1 else gen["tm_streamed"]
        if tm_override is not None:
            tm_goal = _round_up(int(tm_override), 8)
        tm_goal = min(tm_goal, m_cap)
        TM = tm_goal
        while TM > 8 and _tile_vmem_bytes(TM, TF, KF, d_model,
                                          cd_size, out_size) > budget:
            TM = max(8, _round_up(TM // 2, 8))
        if _tile_vmem_bytes(TM, TF, KF, d_model, cd_size, out_size) > budget:
            continue
        if TM >= tm_goal:          # first candidate reaching its TM goal wins
            best = (TM, TF, KF)
            break
        if best is None or TM > best[0]:
            best = (TM, TF, KF)
    if best is None:               # pathological config: smallest chunk, tiny rows
        TF = cands[-1]
        best = (8, TF, d_ff // TF)
    TM, TF, KF = best

    # v7x: make sure the "parallel" row axis has >= 2 tiles so both TCs get work.
    if gen["cores"] >= 2 and pl.cdiv(M, TM) < 2 and M > 8:
        TM = max(8, _round_up((M + 1) // 2, 8))
    return TM, TF, KF


def _block_spec(shape, index_map, buffer_count=None):
    """BlockSpec with optional pipeline depth; silently falls back if unsupported."""
    buffered = getattr(pl, "Buffered", None)
    if buffer_count is not None and buffered is not None:
        try:
            return pl.BlockSpec(shape, index_map,
                                pipeline_mode=buffered(buffer_count))
        except Exception:
            pass
    return pl.BlockSpec(shape, index_map)


# ---------------------------------------------------------------------------
# pallas_call wrapper
# ---------------------------------------------------------------------------
def _ffn_pallas(args, out_dtype, d_model, TM, TF, KF, nm, vmem_limit, cost,
                *, single_buffer):
    x2d = args[0]
    M = x2d.shape[0]
    sb = 1 if single_buffer else None   # buffer count for grid-invariant blocks

    if KF == 1:
        grid = (nm,)
        in_specs = [
            pl.BlockSpec((TM, d_model), lambda i: (i, 0)),          # x rows
            _block_spec((d_model, TF), lambda i: (0, 0), sb),       # w1 (resident)
            _block_spec((1, TF), lambda i: (0, 0), sb),             # b1
            _block_spec((TF, d_model), lambda i: (0, 0), sb),       # w2 (resident)
            _block_spec((1, d_model), lambda i: (0, 0), sb),        # b2
        ]
        out_specs = pl.BlockSpec((TM, d_model), lambda i: (i, 0))
        scratch_shapes = []
        kernel = _ffn_kernel_resident
        dims = ("parallel",)
    else:
        grid = (nm, KF)                                             # reduction last
        in_specs = [
            pl.BlockSpec((TM, d_model), lambda i, k: (i, 0)),       # x rows
            pl.BlockSpec((d_model, TF), lambda i, k: (0, k)),       # w1 chunk
            pl.BlockSpec((1, TF), lambda i, k: (0, k)),             # b1 chunk
            pl.BlockSpec((TF, d_model), lambda i, k: (k, 0)),       # w2 chunk
            _block_spec((1, d_model), lambda i, k: (0, 0), sb),     # b2 (invariant)
        ]
        out_specs = pl.BlockSpec((TM, d_model), lambda i, k: (i, 0))
        scratch_shapes = [pltpu.VMEM((TM, d_model), jnp.float32)]
        kernel = _ffn_kernel_streamed
        dims = ("parallel", "arbitrary")

    return pl.pallas_call(
        kernel,
        out_shape=jax.ShapeDtypeStruct((M, d_model), out_dtype),
        grid_spec=pltpu.PrefetchScalarGridSpec(
            num_scalar_prefetch=0,
            grid=grid,
            in_specs=in_specs,
            out_specs=out_specs,
            scratch_shapes=scratch_shapes,
        ),
        compiler_params=pltpu.CompilerParams(
            dimension_semantics=dims,
            vmem_limit_bytes=int(vmem_limit)),
        cost_estimate=cost,
    )(*args)


_SINGLE_BUFFER_OK = [True]   # flipped off if pipeline_mode=pl.Buffered(1) rejected


def positionwise_feed_forward(x, w1, b1, w2, b2, *,
                              compute_dtype=jnp.bfloat16,
                              tm_override=None, tf_override=None):
    """x: (B, S, d_model); w1: (d_model, d_ff); b1: (d_ff,);
    w2: (d_ff, d_model); b2: (d_model,).  Returns (B, S, d_model) in x.dtype."""
    B, S, d_model = x.shape
    d_ff = w1.shape[1]
    M = B * S
    out_dtype = x.dtype
    cd = jnp.dtype(compute_dtype)
    cd_size = cd.itemsize
    out_size = jnp.dtype(out_dtype).itemsize

    # bf16 MXU operands; fp32 accumulation stays inside the kernel. Biases stay
    # fp32 (they are added to the fp32 accumulator / intermediate).
    x2d = x.reshape(M, d_model).astype(cd)          # no row padding: ragged grid
    w1c = w1.astype(cd)
    w2c = w2.astype(cd)
    b1_2d = b1.reshape(1, d_ff).astype(jnp.float32)
    b2_2d = b2.reshape(1, d_model).astype(jnp.float32)

    gen = _tpu_generation_params()
    TM, TF, KF = _select_tiles(M, d_model, d_ff, cd_size, out_size, gen,
                               tm_override=tm_override, tf_override=tf_override)
    nm = pl.cdiv(M, TM)

    # Weight chunks are re-streamed once per row tile when KF > 1.
    weight_passes = 1 if KF == 1 else nm
    cost = pl.CostEstimate(
        flops=4 * M * d_model * d_ff,
        transcendentals=0,
        bytes_accessed=int(M * d_model * (cd_size + out_size)
                           + weight_passes * 2 * d_model * d_ff * cd_size
                           + 4 * (d_ff + d_model)),
    )

    # TODO(synk): if d_model is not a multiple of 128, pad the weights once
    # (outside the hot path) so output stores are full-lane unmasked writes.

    args = (x2d, w1c, b1_2d, w2c, b2_2d)
    out2d = None
    if _SINGLE_BUFFER_OK[0]:
        try:
            out2d = _ffn_pallas(args, out_dtype, d_model, TM, TF, KF, nm,
                                gen["vmem_limit"], cost, single_buffer=True)
        except Exception:
            _SINGLE_BUFFER_OK[0] = False
    if out2d is None:
        out2d = _ffn_pallas(args, out_dtype, d_model, TM, TF, KF, nm,
                            gen["vmem_limit"], cost, single_buffer=False)
    return out2d.reshape(B, S, d_model)


# ---------------------------------------------------------------------------
# Self-test
# ---------------------------------------------------------------------------
if __name__ == "__main__":
    key = jax.random.PRNGKey(0)

    def make_params(k, d_model, d_ff):
        kw1, kb1, kw2, kb2 = jax.random.split(k, 4)
        # torch nn.Linear stores (out, in); we store the transpose (in, out).
        w1 = jax.random.normal(kw1, (d_model, d_ff), jnp.float32) * 0.1
        b1 = jax.random.normal(kb1, (d_ff,), jnp.float32) * 0.1
        w2 = jax.random.normal(kw2, (d_ff, d_model), jnp.float32) * 0.1
        b2 = jax.random.normal(kb2, (d_model,), jnp.float32) * 0.1
        return w1, b1, w2, b2

    def ref_fn(x, w1, b1, w2, b2, dtype):
        xb, w1b, w2b = x.astype(dtype), w1.astype(dtype), w2.astype(dtype)
        h = jnp.maximum(
            jnp.dot(xb, w1b, preferred_element_type=jnp.float32) + b1, 0.0)
        out = jnp.dot(h.astype(dtype), w2b,
                      preferred_element_type=jnp.float32) + b2
        return out.astype(x.dtype)

    # --- Test 1: module-sized toy shapes (resident KF == 1 path) ------------
    B, S, d_model, d_ff = 2, 8, 32, 64
    kx, kp, key = jax.random.split(key, 3)
    x = jax.random.normal(kx, (B, S, d_model), jnp.float32)
    w1, b1, w2, b2 = make_params(kp, d_model, d_ff)

    out = jax.block_until_ready(positionwise_feed_forward(x, w1, b1, w2, b2))
    ref_bf16 = ref_fn(x, w1, b1, w2, b2, jnp.bfloat16)
    assert out.shape == (B, S, d_model) and out.dtype == x.dtype
    assert jnp.allclose(out, ref_bf16, atol=2e-2, rtol=2e-2)

    out_f32 = jax.block_until_ready(
        positionwise_feed_forward(x, w1, b1, w2, b2,
                                  compute_dtype=jnp.float32))
    ref_f32 = ref_fn(x, w1, b1, w2, b2, jnp.float32)
    assert jnp.allclose(out_f32, ref_f32, atol=2e-5, rtol=2e-5)

    # --- Test 2: streamed accumulator path (KF > 1) + ragged row grid -------
    B2, S2, d_model2, d_ff2 = 2, 20, 128, 256
    kx2, kp2, key = jax.random.split(key, 3)
    x2 = jax.random.normal(kx2, (B2, S2, d_model2), jnp.float32)
    p2 = make_params(kp2, d_model2, d_ff2)
    out2 = jax.block_until_ready(
        positionwise_feed_forward(x2, *p2, tm_override=16, tf_override=128))
    ref2 = ref_fn(x2, *p2, jnp.bfloat16)
    assert out2.shape == (B2, S2, d_model2)
    assert jnp.allclose(out2, ref2, atol=2e-2, rtol=2e-2)

    print("KERNEL_OK")
</pallas_src>

<mosaic_0001>
module attributes {stable_mosaic.version = 11 : i64} {
  func.func @_ffn_kernel_resident(%arg0: i32, %arg1: memref<16x32xbf16, #tpu.memory_space<vmem>>, %arg2: memref<32x64xbf16, #tpu.memory_space<vmem>>, %arg3: memref<1x64xf32, #tpu.memory_space<vmem>>, %arg4: memref<64x32xbf16, #tpu.memory_space<vmem>>, %arg5: memref<1x32xf32, #tpu.memory_space<vmem>>, %arg6: memref<16x32xf32, #tpu.memory_space<vmem>>) attributes {dimension_semantics = [#tpu.dimension_semantics<parallel>], iteration_bounds = array<i64: 1>, scalar_prefetch = 0 : i64, scratch_operands = 0 : i64, tpu.core_type = #tpu.core_type<tc>, window_params = [{transform_indices = @transform_0, window_bounds = array<i64: 16, 32>}, {pipeline_mode = #tpu.pipeline_mode<synchronous>, transform_indices = @transform_1, window_bounds = array<i64: 32, 64>}, {pipeline_mode = #tpu.pipeline_mode<synchronous>, transform_indices = @transform_2, window_bounds = array<i64: 1, 64>}, {pipeline_mode = #tpu.pipeline_mode<synchronous>, transform_indices = @transform_3, window_bounds = array<i64: 64, 32>}, {pipeline_mode = #tpu.pipeline_mode<synchronous>, transform_indices = @transform_4, window_bounds = array<i64: 1, 32>}, {transform_indices = @transform_5, window_bounds = array<i64: 16, 32>}]} {
    %c0 = arith.constant 0 : index
    %c0_0 = arith.constant 0 : index
    %0 = vector.load %arg1[%c0, %c0_0] : memref<16x32xbf16, #tpu.memory_space<vmem>>, vector<16x32xbf16>
    %c0_1 = arith.constant 0 : index
    %c0_2 = arith.constant 0 : index
    %1 = vector.load %arg2[%c0_1, %c0_2] : memref<32x64xbf16, #tpu.memory_space<vmem>>, vector<32x64xbf16>
    %cst = arith.constant dense<0.000000e+00> : vector<16x64xf32>
    %2 = tpu.matmul %0, %1, %cst {dimension_numbers = #tpu.dot_dimension_numbers<[1], [0], [0], [1], [0, 0, 1, 1], [], []>} : vector<16x32xbf16>, vector<32x64xbf16>, vector<16x64xf32> -> vector<16x64xf32>
    %c0_3 = arith.constant 0 : index
    %c0_4 = arith.constant 0 : index
    %3 = vector.load %arg3[%c0_3, %c0_4] : memref<1x64xf32, #tpu.memory_space<vmem>>, vector<1x64xf32>
    %4 = vector.broadcast %3 : vector<1x64xf32> to vector<16x64xf32>
    %5 = arith.addf %2, %4 : vector<16x64xf32>
    %cst_5 = arith.constant 0.000000e+00 : f32
    %6 = vector.broadcast %cst_5 : f32 to vector<16x64xf32>
    %7 = arith.maximumf %5, %6 : vector<16x64xf32>
    %8 = arith.truncf %7 : vector<16x64xf32> to vector<16x64xbf16>
    %c0_6 = arith.constant 0 : index
    %c0_7 = arith.constant 0 : index
    %9 = vector.load %arg4[%c0_6, %c0_7] : memref<64x32xbf16, #tpu.memory_space<vmem>>, vector<64x32xbf16>
    %cst_8 = arith.constant dense<0.000000e+00> : vector<16x32xf32>
    %10 = tpu.matmul %8, %9, %cst_8 {dimension_numbers = #tpu.dot_dimension_numbers<[1], [0], [0], [1], [0, 0, 1, 1], [], []>} : vector<16x64xbf16>, vector<64x32xbf16>, vector<16x32xf32> -> vector<16x32xf32>
    %c0_9 = arith.constant 0 : index
    %c0_10 = arith.constant 0 : index
    %11 = vector.load %arg5[%c0_9, %c0_10] : memref<1x32xf32, #tpu.memory_space<vmem>>, vector<1x32xf32>
    %12 = vector.broadcast %11 : vector<1x32xf32> to vector<16x32xf32>
    %13 = arith.addf %10, %12 : vector<16x32xf32>
    %c0_11 = arith.constant 0 : index
    %c0_12 = arith.constant 0 : index
    %14 = vector.load %arg6[%c0_11, %c0_12] : memref<16x32xf32, #tpu.memory_space<vmem>>, vector<16x32xf32>
    tpu.vector_store %arg6[%c0_11, %c0_12], %13 {strides = array<i32>} : memref<16x32xf32, #tpu.memory_space<vmem>>, vector<16x32xf32>,
    return
  }
  func.func @transform_0(%arg0: i32) -> (i32, i32) {
    %c0_i32 = arith.constant 0 : i32
    %c0_i32_0 = arith.constant 0 : i32
    return %arg0, %c0_i32 : i32, i32
  }
  func.func @transform_1(%arg0: i32) -> (i32, i32) {
    %c0_i32 = arith.constant 0 : i32
    %c0_i32_0 = arith.constant 0 : i32
    %c0_i32_1 = arith.constant 0 : i32
    return %c0_i32, %c0_i32_0 : i32, i32
  }
  func.func @transform_2(%arg0: i32) -> (i32, i32) {
    %c0_i32 = arith.constant 0 : i32
    %c0_i32_0 = arith.constant 0 : i32
    %c0_i32_1 = arith.constant 0 : i32
    return %c0_i32, %c0_i32_0 : i32, i32
  }
  func.func @transform_3(%arg0: i32) -> (i32, i32) {
    %c0_i32 = arith.constant 0 : i32
    %c0_i32_0 = arith.constant 0 : i32
    %c0_i32_1 = arith.constant 0 : i32
    return %c0_i32, %c0_i32_0 : i32, i32
  }
  func.func @transform_4(%arg0: i32) -> (i32, i32) {
    %c0_i32 = arith.constant 0 : i32
    %c0_i32_0 = arith.constant 0 : i32
    %c0_i32_1 = arith.constant 0 : i32
    return %c0_i32, %c0_i32_0 : i32, i32
  }
  func.func @transform_5(%arg0: i32) -> (i32, i32) {
    %c0_i32 = arith.constant 0 : i32
    %c0_i32_0 = arith.constant 0 : i32
    return %arg0, %c0_i32 : i32, i32
  }
}

module attributes {stable_mosaic.version = 11 : i64} {
  func.func @_ffn_kernel_resident(%arg0: i32, %arg1: memref<16x32xbf16, #tpu.memory_space<vmem>>, %arg2: memref<32x64xbf16, #tpu.memory_space<vmem>>, %arg3: memref<1x64xf32, #tpu.memory_space<vmem>>, %arg4: memref<64x32xbf16, #tpu.memory_space<vmem>>, %arg5: memref<1x32xf32, #tpu.memory_space<vmem>>, %arg6: memref<16x32xf32, #tpu.memory_space<vmem>>) attributes {dimension_semantics = [#tpu.dimension_semantics<parallel>], iteration_bounds = array<i64: 1>, scalar_prefetch = 0 : i64, scratch_operands = 0 : i64, tpu.core_type = #tpu.core_type<tc>, window_params = [{transform_indices = @transform_0, window_bounds = array<i64: 16, 32>}, {pipeline_mode = #tpu.pipeline_mode<synchronous>, transform_indices = @transform_1, window_bounds = array<i64: 32, 64>}, {pipeline_mode = #tpu.pipeline_mode<synchronous>, transform_indices = @transform_2, window_bounds = array<i64: 1, 64>}, {pipeline_mode = #tpu.pipeline_mode<synchronous>, transform_indices = @transform_3, window_bounds = array<i64: 64, 32>}, {pipeline_mode = #tpu.pipeline_mode<synchronous>, transform_indices = @transform_4, window_bounds = array<i64: 1, 32>}, {transform_indices = @transform_5, window_bounds = array<i64: 16, 32>}]} {
    %c0 = arith.constant 0 : index
    %c0_0 = arith.constant 0 : index
    %0 = vector.load %arg1[%c0, %c0_0] : memref<16x32xbf16, #tpu.memory_space<vmem>>, vector<16x32xbf16>
    %c0_1 = arith.constant 0 : index
    %c0_2 = arith.constant 0 : index
    %1 = vector.load %arg2[%c0_1, %c0_2] : memref<32x64xbf16, #tpu.memory_space<vmem>>, vector<32x64xbf16>
    %cst = arith.constant dense<0.000000e+00> : vector<16x64xf32>
    %2 = tpu.matmul %0, %1, %cst {dimension_numbers = #tpu.dot_dimension_numbers<[1], [0], [0], [1], [0, 0, 1, 1], [], []>} : vector<16x32xbf16>, vector<32x64xbf16>, vector<16x64xf32> -> vector<16x64xf32>
    %c0_3 = arith.constant 0 : index
    %c0_4 = arith.constant 0 : index
    %3 = vector.load %arg3[%c0_3, %c0_4] : memref<1x64xf32, #tpu.memory_space<vmem>>, vector<1x64xf32>
    %4 = vector.broadcast %3 : vector<1x64xf32> to vector<16x64xf32>
    %5 = arith.addf %2, %4 : vector<16x64xf32>
    %cst_5 = arith.constant 0.000000e+00 : f32
    %6 = vector.broadcast %cst_5 : f32 to vector<16x64xf32>
    %7 = arith.maximumf %5, %6 : vector<16x64xf32>
    %8 = arith.truncf %7 : vector<16x64xf32> to vector<16x64xbf16>
    %c0_6 = arith.constant 0 : index
    %c0_7 = arith.constant 0 : index
    %9 = vector.load %arg4[%c0_6, %c0_7] : memref<64x32xbf16, #tpu.memory_space<vmem>>, vector<64x32xbf16>
    %cst_8 = arith.constant dense<0.000000e+00> : vector<16x32xf32>
    %10 = tpu.matmul %8, %9, %cst_8 {dimension_numbers = #tpu.dot_dimension_numbers<[1], [0], [0], [1], [0, 0, 1, 1], [], []>} : vector<16x64xbf16>, vector<64x32xbf16>, vector<16x32xf32> -> vector<16x32xf32>
    %c0_9 = arith.constant 0 : index
    %c0_10 = arith.constant 0 : index
    %11 = vector.load %arg5[%c0_9, %c0_10] : memref<1x32xf32, #tpu.memory_space<vmem>>, vector<1x32xf32>
    %12 = vector.broadcast %11 : vector<1x32xf32> to vector<16x32xf32>
    %13 = arith.addf %10, %12 : vector<16x32xf32>
    %c0_11 = arith.constant 0 : index
    %c0_12 = arith.constant 0 : index
    %14 = vector.load %arg6[%c0_11, %c0_12] : memref<16x32xf32, #tpu.memory_space<vmem>>, vector<16x32xf32>
    tpu.vector_store %arg6[%c0_11, %c0_12], %13 {strides = array<i32>} : memref<16x32xf32, #tpu.memory_space<vmem>>, vector<16x32xf32>,
    return
  }
  func.func @transform_0(%arg0: i32) -> (i32, i32) {
    %c0_i32 = arith.constant 0 : i32
    %c0_i32_0 = arith.constant 0 : i32
    return %arg0, %c0_i32 : i32, i32
  }
  func.func @transform_1(%arg0: i32) -> (i32, i32) {
    %c0_i32 = arith.constant 0 : i32
    %c0_i32_0 = arith.constant 0 : i32
    %c0_i32_1 = arith.constant 0 : i32
    return %c0_i32, %c0_i32_0 : i32, i32
  }
  func.func @transform_2(%arg0: i32) -> (i32, i32) {
    %c0_i32 = arith.constant 0 : i32
    %c0_i32_0 = arith.constant 0 : i32
    %c0_i32_1 = arith.constant 0 : i32
    return %c0_i32, %c0_i32_0 : i32, i32
  }
  func.func @transform_3(%arg0: i32) -> (i32, i32) {
    %c0_i32 = arith.constant 0 : i32
    %c0_i32_0 = arith.constant 0 : i32
    %c0_i32_1 = arith.constant 0 : i32
    return %c0_i32, %c0_i32_0 : i32, i32
  }
  func.func @transform_4(%arg0: i32) -> (i32, i32) {
    %c0_i32 = arith.constant 0 : i32
    %c0_i32_0 = arith.constant 0 : i32
    %c0_i32_1 = arith.constant 0 : i32
    return %c0_i32, %c0_i32_0 : i32, i32
  }
  func.func @transform_5(%arg0: i32) -> (i32, i32) {
    %c0_i32 = arith.constant 0 : i32
    %c0_i32_0 = arith.constant 0 : i32
    return %arg0, %c0_i32 : i32, i32
  }
}

</mosaic_0001>

<bundles_post_ra>
// kernel: tpu_custom_call.1
= control target key start
LH: loop header
LB: loop body
LE: loop exit
PB: predicated region body
PF: predicated region fallthrough
CT: control target
= control target key end

     0   :  { %v277_v1 = vmov 0.0   ;;  %vm278_vm0 = vmmov 0   ;;  %vm52_vm1 = vcmask 261120   ;;  %s354_s0 = inlined_call_operand.vmem [shape: bf16[16,32], index: 0, kind: input, shape index: {}]   ;;  %s355_s1 = inlined_call_operand.vmem [shape: bf16[32,64], index: 1, kind: input, shape index: {}]   ;;  %s356_s2 = inlined_call_operand.vmem [shape: f32[1,64], index: 2, kind: input, shape index: {}]   ;;  %s357_s3 = inlined_call_operand.vmem [shape: bf16[64,32], index: 3, kind: input, shape index: {}]   ;;  %s358_s4 = inlined_call_operand.vmem [shape: f32[1,32], index: 4, kind: input, shape index: {}]   ;;  %s359_s5 = inlined_call_operand.hbm [shape: f32[16,32], index: 5, kind: output, shape index: {}]  }
   0x1   :  { %v246_v0 = vld [vmem:[%s355_s1] sm:$0xff]   ;;  %221 = vmatprep.subr.bf16.mxu0 %v277_v1  ;;  %229 = vmatprep.subr.bf16.mxu1 %v277_v1  ;;  %v247_v2 = vld [vmem:[%s355_s1 + $0x8] sm:$0xff]  }
   0x2   :  { %222 = vmatpush3.bf16.msra.mxu0 %v246_v0  ;;  %225 = vmatprep.mubr.msk.bf16.mxu0 %vm278_vm0, %v277_v1  ;;  %v249_v3 = vld [vmem:[%s357_s3] sm:$0xff]   ;;  %v250_v5 = vld [vmem:[%s357_s3 + $0x8] sm:$0xff]  }
   0x3   :  { %223 = vmatprep.subr.bf16.mxu0 %v277_v1  ;;  %237 = vmatprep.mubr.msk.bf16.mxu1 %vm278_vm0, %v277_v1  ;;  %v248_v4 = vld [vmem:[%s354_s0] sm:$0xff]  }
   0x4   :  { %230 = vmatpush3.bf16.msra.mxu1 %v249_v3 }
   0x5   :  { %231 = vmatprep.subr.bf16.mxu1 %v277_v1 }
   0x6   :  { %224 = vmatpush3.bf16.msra.mxu0 %v247_v2 }
   0x7   :  { %10 = vsyncpa [#allocation3], 0  ;;  %v251_v6 = vld [vmem:[%s357_s3 + $0x10] sm:$0xff]   ;;  %v252_v7 = vld [vmem:[%s357_s3 + $0x18] sm:$0xff]   ;;  %vm139_vm2 = vcmask 523264   ;;  %s279_s3 = smov [#allocation2]  }
   0x8   :  { %232 = vmatpush3.bf16.msra.mxu1 %v250_v5  ;;  %v202_v8 = vld [vmem:[%s356_s2] ss:$0 sm:$0xff]  ;;  %s191_s9 = sshll.u32 %s279_s3, 4  ;;  %s192_s9 = int_to_ptr.vmem [resolvable:$true] %s191_s9 }
   0x9   :  { %226 = vmatmul.mubr.msk.bf16.vlgmr.msra.gmra.mrb[0].mxu0 %vm52_vm1, %v248_v4  ;;  %233 = vmatprep.subr.bf16.mxu1 %v277_v1  ;;  %v207_v18 = vld [vmem:[%s358_s4] ss:$0 sm:$0xff]  ;;  %s253_s2 = scalar_lea.vmem %s192_s9, 256  ;;  %p258_p1 = scmp.lt.s32.totalorder %s192_s9, %s192_s9 }
   0xa   :  { %p254_p0 = scmp.ne.s32.totalorder %s192_s9, %s253_s2  ;;  %p259_p2 = scmp.lt.s32.totalorder %s253_s2, %s253_s2 }
   0xc   :  { %234 = vmatpush3.bf16.msra.mxu1 %v251_v6  ;;  %p260_p3 = por %p259_p2, %p258_p1 }
   0xd   :  { %235 = vmatprep.subr.bf16.mxu1 %v277_v1 }
   0xe   :  { %p261_p4 = pnand %p260_p3, %p254_p0 }
  0x10   :  { %236 = vmatpush3.bf16.msra.mxu1 %v252_v7 }
  0xdc   :  { %v90_v9 = vpop.f32.mrb[0].mxu0 }
  0xdd   :  { %v91_v10 = vadd.f32 %v202_v8, %v90_v9  ;;  %v227_v11 = vpop.f32.mrb[1].mxu0 }
  0xde   :  { %v93_v12 = vpop.f32.mrb[2].mxu0 }
  0xdf   :  { %v94_v13 = vadd.f32 %v202_v8, %v93_v12  ;;  %v228_v14 = vpop.f32.mrb[3].mxu0  ;;  %v97_v15 = vmax.f32 %v91_v10, 0.0 }
  0xe1   :  { %v98_v16 = vmax.f32 %v94_v13, 0.0 }
  0xe3   :  { %v99_v17 = vpack.c.bf16 %v98_v16, %v97_v15 }
  0xe5   :  { %238 = vmatmul.mubr.msk.bf16.vlgmr.msra.gmra.mrb[0].mxu1 %vm139_vm2, %v99_v17 }
 0x1b8   :  { %v177_v19 = vpop.f32.mrb[0].mxu1 }
 0x1b9   :  { %v178_v20 = vadd.f32 %v207_v18, %v177_v19  ;;  %v239_v21 = vpop.f32.mrb[1].mxu1 }
 0x1ba   :  { %v180_v22 = vpop.f32.mrb[2].mxu1 }
 0x1bb   :  { %184 = vst.msk [vmem:[#allocation2] sm:$0xff] %vm52_vm1, %v178_v20  ;;  %v181_v23 = vadd.f32 %v207_v18, %v180_v22  ;;  %v240_v24 = vpop.f32.mrb[3].mxu1 }
 0x1bd   :  { %185 = vst.msk [vmem:[#allocation2 + $0x8] sm:$0xff] %vm52_vm1, %v181_v23 }
 0x1be   :  { %264 = shalt.err (!%p261_p4)
}
 0x1bf   :  { %s265_s11 = scalar_lea.hbm %s359_s5, 256 }
 0x1c0   :  { %p266_p5 = scmp.ne.s32.totalorder %s359_s5, %s265_s11  ;;  %p269_p6 = scmp.lt.u32.totalorder %s265_s11, %s359_s5 }
 0x1c2   :  { %p271_p7 = pnand %p269_p6, %p266_p5 }
 0x1c4   :  { %274 = shalt.err (!%p271_p7)
}
 0x1c5   :  { %s280_s16 = smov 128   ;;  %s281_s17 = smov 8  }
 0x1c6   :  { %197 = dma.vmem_to_hbm [thread:$0]  %s192_s9, 256, %s359_s5, [#allocation3], %s280_s16, %s280_s16, %s281_s17  }
 0x1c7   :  { %275 = dma.done.wait [#allocation3], 256  }
 0x1c8   :  { %276 = vsyncadd [#allocation3], 4294967040 }
 0x1c9   :  { %201 = vsyncpa [#allocation3], 1 }

// kernel: tpu_custom_call.1
= control target key start
LH: loop header
LB: loop body
LE: loop exit
PB: predicated region body
PF: predicated region fallthrough
CT: control target
= control target key end

     0   :  { %v277_v1 = vmov 0.0   ;;  %vm278_vm0 = vmmov 0   ;;  %vm52_vm1 = vcmask 261120   ;;  %s354_s0 = inlined_call_operand.vmem [shape: bf16[16,32], index: 0, kind: input, shape index: {}]   ;;  %s355_s1 = inlined_call_operand.vmem [shape: bf16[32,64], index: 1, kind: input, shape index: {}]   ;;  %s356_s2 = inlined_call_operand.vmem [shape: f32[1,64], index: 2, kind: input, shape index: {}]   ;;  %s357_s3 = inlined_call_operand.vmem [shape: bf16[64,32], index: 3, kind: input, shape index: {}]   ;;  %s358_s4 = inlined_call_operand.vmem [shape: f32[1,32], index: 4, kind: input, shape index: {}]   ;;  %s359_s5 = inlined_call_operand.hbm [shape: f32[16,32], index: 5, kind: output, shape index: {}]  }
   0x1   :  { %v246_v0 = vld [vmem:[%s355_s1] sm:$0xff]   ;;  %221 = vmatprep.subr.bf16.mxu0 %v277_v1  ;;  %229 = vmatprep.subr.bf16.mxu1 %v277_v1  ;;  %v247_v2 = vld [vmem:[%s355_s1 + $0x8] sm:$0xff]  }
   0x2   :  { %222 = vmatpush3.bf16.msra.mxu0 %v246_v0  ;;  %225 = vmatprep.mubr.msk.bf16.mxu0 %vm278_vm0, %v277_v1  ;;  %v249_v3 = vld [vmem:[%s357_s3] sm:$0xff]   ;;  %v250_v5 = vld [vmem:[%s357_s3 + $0x8] sm:$0xff]  }
   0x3   :  { %223 = vmatprep.subr.bf16.mxu0 %v277_v1  ;;  %237 = vmatprep.mubr.msk.bf16.mxu1 %vm278_vm0, %v277_v1  ;;  %v248_v4 = vld [vmem:[%s354_s0] sm:$0xff]  }
   0x4   :  { %230 = vmatpush3.bf16.msra.mxu1 %v249_v3 }
   0x5   :  { %231 = vmatprep.subr.bf16.mxu1 %v277_v1 }
   0x6   :  { %224 = vmatpush3.bf16.msra.mxu0 %v247_v2 }
   0x7   :  { %10 = vsyncpa [#allocation3], 0  ;;  %v251_v6 = vld [vmem:[%s357_s3 + $0x10] sm:$0xff]   ;;  %v252_v7 = vld [vmem:[%s357_s3 + $0x18] sm:$0xff]   ;;  %vm139_vm2 = vcmask 523264   ;;  %s279_s3 = smov [#allocation2]  }
   0x8   :  { %232 = vmatpush3.bf16.msra.mxu1 %v250_v5  ;;  %v202_v8 = vld [vmem:[%s356_s2] ss:$0 sm:$0xff]  ;;  %s191_s9 = sshll.u32 %s279_s3, 4  ;;  %s192_s9 = int_to_ptr.vmem [resolvable:$true] %s191_s9 }
   0x9   :  { %226 = vmatmul.mubr.msk.bf16.vlgmr.msra.gmra.mrb[0].mxu0 %vm52_vm1, %v248_v4  ;;  %233 = vmatprep.subr.bf16.mxu1 %v277_v1  ;;  %v207_v18 = vld [vmem:[%s358_s4] ss:$0 sm:$0xff]  ;;  %s253_s2 = scalar_lea.vmem %s192_s9, 256  ;;  %p258_p1 = scmp.lt.s32.totalorder %s192_s9, %s192_s9 }
   0xa   :  { %p254_p0 = scmp.ne.s32.totalorder %s192_s9, %s253_s2  ;;  %p259_p2 = scmp.lt.s32.totalorder %s253_s2, %s253_s2 }
   0xc   :  { %234 = vmatpush3.bf16.msra.mxu1 %v251_v6  ;;  %p260_p3 = por %p259_p2, %p258_p1 }
   0xd   :  { %235 = vmatprep.subr.bf16.mxu1 %v277_v1 }
   0xe   :  { %p261_p4 = pnand %p260_p3, %p254_p0 }
  0x10   :  { %236 = vmatpush3.bf16.msra.mxu1 %v252_v7 }
  0xdc   :  { %v90_v9 = vpop.f32.mrb[0].mxu0 }
  0xdd   :  { %v91_v10 = vadd.f32 %v202_v8, %v90_v9  ;;  %v227_v11 = vpop.f32.mrb[1].mxu0 }
  0xde   :  { %v93_v12 = vpop.f32.mrb[2].mxu0 }
  0xdf   :  { %v94_v13 = vadd.f32 %v202_v8, %v93_v12  ;;  %v228_v14 = vpop.f32.mrb[3].mxu0  ;;  %v97_v15 = vmax.f32 %v91_v10, 0.0 }
  0xe1   :  { %v98_v16 = vmax.f32 %v94_v13, 0.0 }
  0xe3   :  { %v99_v17 = vpack.c.bf16 %v98_v16, %v97_v15 }
  0xe5   :  { %238 = vmatmul.mubr.msk.bf16.vlgmr.msra.gmra.mrb[0].mxu1 %vm139_vm2, %v99_v17 }
 0x1b8   :  { %v177_v19 = vpop.f32.mrb[0].mxu1 }
 0x1b9   :  { %v178_v20 = vadd.f32 %v207_v18, %v177_v19  ;;  %v239_v21 = vpop.f32.mrb[1].mxu1 }
 0x1ba   :  { %v180_v22 = vpop.f32.mrb[2].mxu1 }
 0x1bb   :  { %184 = vst.msk [vmem:[#allocation2] sm:$0xff] %vm52_vm1, %v178_v20  ;;  %v181_v23 = vadd.f32 %v207_v18, %v180_v22  ;;  %v240_v24 = vpop.f32.mrb[3].mxu1 }
 0x1bd   :  { %185 = vst.msk [vmem:[#allocation2 + $0x8] sm:$0xff] %vm52_vm1, %v181_v23 }
 0x1be   :  { %264 = shalt.err (!%p261_p4)
}
 0x1bf   :  { %s265_s11 = scalar_lea.hbm %s359_s5, 256 }
 0x1c0   :  { %p266_p5 = scmp.ne.s32.totalorder %s359_s5, %s265_s11  ;;  %p269_p6 = scmp.lt.u32.totalorder %s265_s11, %s359_s5 }
 0x1c2   :  { %p271_p7 = pnand %p269_p6, %p266_p5 }
 0x1c4   :  { %274 = shalt.err (!%p271_p7)
}
 0x1c5   :  { %s280_s16 = smov 128   ;;  %s281_s17 = smov 8  }
 0x1c6   :  { %197 = dma.vmem_to_hbm [thread:$0]  %s192_s9, 256, %s359_s5, [#allocation3], %s280_s16, %s280_s16, %s281_s17  }
 0x1c7   :  { %275 = dma.done.wait [#allocation3], 256  }
 0x1c8   :  { %276 = vsyncadd [#allocation3], 4294967040 }
 0x1c9   :  { %201 = vsyncpa [#allocation3], 1 }

</bundles_post_ra>
